<compile_context>
chip_gen: v6e
topology: v6e:2x2x1
jax: 0.10.0
libtpu: 0.0.40
codegen_flags: <defaults>
</compile_context>

<pallas_src>
import functools

import jax
import jax.numpy as jnp
from jax import lax
from jax.experimental import pallas as pl
from jax.experimental.pallas import tpu as pltpu


def _round_up(x: int, m: int) -> int:
    return ((x + m - 1) // m) * m


def _choose_tm(batch: int, tm_max: int) -> int:
    """Batch tile size: sublane-aligned, and >=2 grid steps when batch is large."""
    if batch <= 8:
        return batch                      # tiny batch: one tile, block dim == array dim
    if batch <= tm_max:
        # split into ~2 tiles so ("parallel",) can use both v7x TensorCores
        return min(_round_up(pl.cdiv(batch, 2), 8), tm_max)
    return tm_max


def _linear_kernel(x_ref, wt_ref, b_ref, o_ref, *, fuse_residual: bool):
    # x_ref:  (TM, IN)        batch tile
    # wt_ref: (IN, OUT_PAD)   pre-transposed, lane-padded weight (VMEM-resident)
    # b_ref:  (1, OUT_PAD)    lane-padded bias
    # o_ref:  (TM, OUT_PAD)   lane-dense output tile
    x = x_ref[...]
    acc = lax.dot_general(
        x, wt_ref[...],
        dimension_numbers=(((1,), (0,)), ((), ())),
        preferred_element_type=jnp.float32,
    )
    acc = acc + b_ref[...].astype(jnp.float32)
    if fuse_residual:
        # Only taken when OUT == IN.  Add the residual into the first IN columns
        # directly (no jnp.pad copy of the residual in vregs).
        res = x.astype(jnp.float32)
        acc = acc.at[:, : res.shape[-1]].add(res)
    o_ref[...] = acc.astype(o_ref.dtype)


def prepare_linear_params(weight, bias, *, lane_pad: int = 128, compute_dtype=None):
    """One-time weight transpose + lane padding (hoisted out of the forward path).

    lane_pad=128 keeps the output lane-dense (unmasked vst) on all generations while
    avoiding the 2x wasted writeback / padded weight columns that 256 would cost
    (and halves the MXU N-passes on v5e's 128-wide MXU).
    """
    OUT, IN = weight.shape
    OUT_PAD = _round_up(OUT, lane_pad)
    w_dtype = compute_dtype if compute_dtype is not None else weight.dtype
    wt = jnp.zeros((IN, OUT_PAD), w_dtype).at[:, :OUT].set(weight.T.astype(w_dtype))
    b2 = jnp.zeros((1, OUT_PAD), bias.dtype).at[0, :OUT].set(bias)
    return wt, b2, OUT


def linear_maybe_residual(x, wt, b2, out_features, *, fuse_residual: bool,
                          tm_max: int = 512, compute_dtype=None):
    B, IN = x.shape
    IN_w, OUT_PAD = wt.shape
    assert IN == IN_w, "weight in_features mismatch"

    if compute_dtype is not None:
        x = x.astype(compute_dtype)   # optional bf16 operands; accumulation stays f32

    TM = _choose_tm(B, tm_max)
    grid = (pl.cdiv(B, TM),)

    itemsize = jnp.dtype(x.dtype).itemsize
    # Accurate (un-padded) advisory cost for the XLA scheduler.
    cost = pl.CostEstimate(
        flops=2 * B * IN * out_features,
        transcendentals=0,
        bytes_accessed=(B * IN + IN * out_features + out_features
                        + B * out_features) * itemsize,
    )

    kernel = functools.partial(_linear_kernel, fuse_residual=fuse_residual)

    def build(resident_pipeline_mode):
        return pl.pallas_call(
            kernel,
            out_shape=jax.ShapeDtypeStruct((B, OUT_PAD), x.dtype),
            grid=grid,
            in_specs=[
                pl.BlockSpec((TM, IN), lambda i: (i, 0)),          # batch tile of x
                pl.BlockSpec((IN_w, OUT_PAD), lambda i: (0, 0),    # resident weight
                             pipeline_mode=resident_pipeline_mode),
                pl.BlockSpec((1, OUT_PAD), lambda i: (0, 0),       # resident bias
                             pipeline_mode=resident_pipeline_mode),
            ],
            out_specs=pl.BlockSpec((TM, OUT_PAD), lambda i: (i, 0)),
            compiler_params=pltpu.CompilerParams(
                dimension_semantics=("parallel",),                 # shard batch across TCs
                vmem_limit_bytes=32 * 1024 * 1024,
            ),
            cost_estimate=cost,
        )

    try:
        # Constant index_map -> single-buffer the resident weight/bias (saves VMEM,
        # matters most on v7x's 64 MiB if the layer is generalized).
        out_padded = build(pl.Buffered(1))(x, wt, b2)
    except Exception:
        # Fallback: default double-buffering if this JAX build rejects Buffered(1).
        out_padded = build(None)(x, wt, b2)

    # Slice the lane padding away (cheap XLA slice outside the kernel).
    return out_padded[:, :out_features]


class PallasLinearResidualModel:
    """JAX/Pallas equivalent of Model.forward with constant params prepared once."""

    def __init__(self, weight, bias, *, compute_dtype=None):
        self._out, self._in = weight.shape
        self._compute_dtype = compute_dtype
        self.wt, self.b2, self.out_features = prepare_linear_params(
            weight, bias, lane_pad=128, compute_dtype=compute_dtype)
        # The residual add is only mathematically defined when OUT == IN.
        self.fuse_residual = (self._out == self._in)

    def __call__(self, x1):
        # TODO(synk): the original module does `v1 + x1` with shapes (B, 100) + (B, 196),
        # which raises a broadcasting error in PyTorch; there is no valid semantics to
        # reproduce, so only the (valid) linear part is computed when OUT != IN.
        return linear_maybe_residual(
            x1, self.wt, self.b2, self.out_features,
            fuse_residual=self.fuse_residual,
            compute_dtype=self._compute_dtype,
        )


if __name__ == "__main__":
    IN_FEATURES = 196
    OUT_FEATURES = 100
    BATCH = 1

    key = jax.random.PRNGKey(0)
    kx, kw, kb = jax.random.split(key, 3)

    # Deterministic parameter init mimicking torch.nn.Linear (uniform +/- 1/sqrt(in)).
    bound = 1.0 / (IN_FEATURES ** 0.5)
    weight = jax.random.uniform(
        kw, (OUT_FEATURES, IN_FEATURES), jnp.float32, minval=-bound, maxval=bound)
    bias = jax.random.uniform(
        kb, (OUT_FEATURES,), jnp.float32, minval=-bound, maxval=bound)
    x1 = jax.random.normal(kx, (BATCH, IN_FEATURES), jnp.float32)

    model = PallasLinearResidualModel(weight, bias)   # weight prep happens once, here
    out = model(x1)
    out = jax.block_until_ready(out)

    # Sanity check of the Pallas matmul+bias against plain JAX.
    ref = x1 @ weight.T + bias
    assert out.shape == (BATCH, OUT_FEATURES)
    assert jnp.allclose(out, ref, atol=1e-5, rtol=1e-5)

    print("KERNEL_OK")
</pallas_src>

<mosaic_0001>
module attributes {stable_mosaic.version = 11 : i64} {
  func.func @_linear_kernel(%arg0: i32, %arg1: memref<1x196xf32, #tpu.memory_space<vmem>>, %arg2: memref<196x128xf32, #tpu.memory_space<vmem>>, %arg3: memref<1x128xf32, #tpu.memory_space<vmem>>, %arg4: memref<1x128xf32, #tpu.memory_space<vmem>>) attributes {dimension_semantics = [#tpu.dimension_semantics<parallel>], iteration_bounds = array<i64: 1>, scalar_prefetch = 0 : i64, scratch_operands = 0 : i64, tpu.core_type = #tpu.core_type<tc>, window_params = [{transform_indices = @transform_0, window_bounds = array<i64: 1, 196>}, {pipeline_mode = #tpu.pipeline_mode<synchronous>, transform_indices = @transform_1, window_bounds = array<i64: 196, 128>}, {pipeline_mode = #tpu.pipeline_mode<synchronous>, transform_indices = @transform_2, window_bounds = array<i64: 1, 128>}, {transform_indices = @transform_3, window_bounds = array<i64: 1, 128>}]} {
    %c0 = arith.constant 0 : index
    %c0_0 = arith.constant 0 : index
    %0 = vector.load %arg1[%c0, %c0_0] : memref<1x196xf32, #tpu.memory_space<vmem>>, vector<1x196xf32>
    %c0_1 = arith.constant 0 : index
    %c0_2 = arith.constant 0 : index
    %1 = vector.load %arg2[%c0_1, %c0_2] : memref<196x128xf32, #tpu.memory_space<vmem>>, vector<196x128xf32>
    %cst = arith.constant dense<0.000000e+00> : vector<1x128xf32>
    %2 = tpu.matmul %0, %1, %cst {dimension_numbers = #tpu.dot_dimension_numbers<[1], [0], [0], [1], [0, 0, 1, 1], [], []>} : vector<1x196xf32>, vector<196x128xf32>, vector<1x128xf32> -> vector<1x128xf32>
    %c0_3 = arith.constant 0 : index
    %c0_4 = arith.constant 0 : index
    %3 = vector.load %arg3[%c0_3, %c0_4] : memref<1x128xf32, #tpu.memory_space<vmem>>, vector<1x128xf32>
    %4 = arith.addf %2, %3 : vector<1x128xf32>
    %c0_5 = arith.constant 0 : index
    %c0_6 = arith.constant 0 : index
    %5 = vector.load %arg4[%c0_5, %c0_6] : memref<1x128xf32, #tpu.memory_space<vmem>>, vector<1x128xf32>
    tpu.vector_store %arg4[%c0_5, %c0_6], %4 {strides = array<i32>} : memref<1x128xf32, #tpu.memory_space<vmem>>, vector<1x128xf32>,
    return
  }
  func.func @transform_0(%arg0: i32) -> (i32, i32) {
    %c0_i32 = arith.constant 0 : i32
    %c0_i32_0 = arith.constant 0 : i32
    return %arg0, %c0_i32 : i32, i32
  }
  func.func @transform_1(%arg0: i32) -> (i32, i32) {
    %c0_i32 = arith.constant 0 : i32
    %c0_i32_0 = arith.constant 0 : i32
    %c0_i32_1 = arith.constant 0 : i32
    return %c0_i32, %c0_i32_0 : i32, i32
  }
  func.func @transform_2(%arg0: i32) -> (i32, i32) {
    %c0_i32 = arith.constant 0 : i32
    %c0_i32_0 = arith.constant 0 : i32
    %c0_i32_1 = arith.constant 0 : i32
    return %c0_i32, %c0_i32_0 : i32, i32
  }
  func.func @transform_3(%arg0: i32) -> (i32, i32) {
    %c0_i32 = arith.constant 0 : i32
    %c0_i32_0 = arith.constant 0 : i32
    return %arg0, %c0_i32 : i32, i32
  }
}

module attributes {stable_mosaic.version = 11 : i64} {
  func.func @_linear_kernel(%arg0: i32, %arg1: memref<1x196xf32, #tpu.memory_space<vmem>>, %arg2: memref<196x128xf32, #tpu.memory_space<vmem>>, %arg3: memref<1x128xf32, #tpu.memory_space<vmem>>, %arg4: memref<1x128xf32, #tpu.memory_space<vmem>>) attributes {dimension_semantics = [#tpu.dimension_semantics<parallel>], iteration_bounds = array<i64: 1>, scalar_prefetch = 0 : i64, scratch_operands = 0 : i64, tpu.core_type = #tpu.core_type<tc>, window_params = [{transform_indices = @transform_0, window_bounds = array<i64: 1, 196>}, {pipeline_mode = #tpu.pipeline_mode<synchronous>, transform_indices = @transform_1, window_bounds = array<i64: 196, 128>}, {pipeline_mode = #tpu.pipeline_mode<synchronous>, transform_indices = @transform_2, window_bounds = array<i64: 1, 128>}, {transform_indices = @transform_3, window_bounds = array<i64: 1, 128>}]} {
    %c0 = arith.constant 0 : index
    %c0_0 = arith.constant 0 : index
    %0 = vector.load %arg1[%c0, %c0_0] : memref<1x196xf32, #tpu.memory_space<vmem>>, vector<1x196xf32>
    %c0_1 = arith.constant 0 : index
    %c0_2 = arith.constant 0 : index
    %1 = vector.load %arg2[%c0_1, %c0_2] : memref<196x128xf32, #tpu.memory_space<vmem>>, vector<196x128xf32>
    %cst = arith.constant dense<0.000000e+00> : vector<1x128xf32>
    %2 = tpu.matmul %0, %1, %cst {dimension_numbers = #tpu.dot_dimension_numbers<[1], [0], [0], [1], [0, 0, 1, 1], [], []>} : vector<1x196xf32>, vector<196x128xf32>, vector<1x128xf32> -> vector<1x128xf32>
    %c0_3 = arith.constant 0 : index
    %c0_4 = arith.constant 0 : index
    %3 = vector.load %arg3[%c0_3, %c0_4] : memref<1x128xf32, #tpu.memory_space<vmem>>, vector<1x128xf32>
    %4 = arith.addf %2, %3 : vector<1x128xf32>
    %c0_5 = arith.constant 0 : index
    %c0_6 = arith.constant 0 : index
    %5 = vector.load %arg4[%c0_5, %c0_6] : memref<1x128xf32, #tpu.memory_space<vmem>>, vector<1x128xf32>
    tpu.vector_store %arg4[%c0_5, %c0_6], %4 {strides = array<i32>} : memref<1x128xf32, #tpu.memory_space<vmem>>, vector<1x128xf32>,
    return
  }
  func.func @transform_0(%arg0: i32) -> (i32, i32) {
    %c0_i32 = arith.constant 0 : i32
    %c0_i32_0 = arith.constant 0 : i32
    return %arg0, %c0_i32 : i32, i32
  }
  func.func @transform_1(%arg0: i32) -> (i32, i32) {
    %c0_i32 = arith.constant 0 : i32
    %c0_i32_0 = arith.constant 0 : i32
    %c0_i32_1 = arith.constant 0 : i32
    return %c0_i32, %c0_i32_0 : i32, i32
  }
  func.func @transform_2(%arg0: i32) -> (i32, i32) {
    %c0_i32 = arith.constant 0 : i32
    %c0_i32_0 = arith.constant 0 : i32
    %c0_i32_1 = arith.constant 0 : i32
    return %c0_i32, %c0_i32_0 : i32, i32
  }
  func.func @transform_3(%arg0: i32) -> (i32, i32) {
    %c0_i32 = arith.constant 0 : i32
    %c0_i32_0 = arith.constant 0 : i32
    return %arg0, %c0_i32 : i32, i32
  }
}

</mosaic_0001>

<bundles_post_ra>
// kernel: tpu_custom_call.1
= control target key start
LH: loop header
LB: loop body
LE: loop exit
PB: predicated region body
PF: predicated region fallthrough
CT: control target
= control target key end

     0   :  { %8 = vsyncpa [#allocation3], 0  ;;  %s317_s0 = inlined_call_operand.hbm [shape: f32[1,196], index: 0, kind: input, shape index: {}]   ;;  %s318_s1 = inlined_call_operand.hbm [shape: f32[196,128], index: 1, kind: input, shape index: {}]   ;;  %s319_s2 = inlined_call_operand.vmem [shape: f32[1,128], index: 2, kind: input, shape index: {}]   ;;  %s320_s3 = inlined_call_operand.hbm [shape: f32[1,128], index: 3, kind: output, shape index: {}]  }
   0x1   :  { %9 = vsyncpa [#allocation6], 0 }
   0x2   :  { %10 = vsyncpa [#allocation4], 0  ;;  %s246_s12 = smov [#allocation2]   ;;  %s247_s14 = smov [#allocation5]  }
   0x3   :  { %s17_s13 = sshll.u32 %s246_s12, 4  ;;  %s26_s15 = sshll.u32 %s247_s14, 4  ;;  %s18_s13 = int_to_ptr.vmem [resolvable:$true] %s17_s13  ;;  %s27_s15 = int_to_ptr.vmem [resolvable:$true] %s26_s15 }
   0x4   :  { %s188_s16 = scalar_lea.vmem %s18_s13, 32  ;;  %p193_p1 = scmp.lt.s32.totalorder %s18_s13, %s18_s13 }
   0x5   :  { %p189_p0 = scmp.ne.s32.totalorder %s18_s13, %s188_s16  ;;  %p194_p2 = scmp.lt.s32.totalorder %s188_s16, %s188_s16 }
   0x7   :  { %p195_p3 = por %p194_p2, %p193_p1 }
   0x9   :  { %p196_p4 = pnand %p195_p3, %p189_p0 }
   0xb   :  { %199 = shalt.err (!%p196_p4)
}
   0xc   :  { %20 = dma.hbm_to_vmem [thread:$0]  %s317_s0, 32, %s18_s13, [#allocation3]  }
   0xd   :  { %s208_s19 = scalar_lea.vmem %s27_s15, 3200  ;;  %p213_p6 = scmp.lt.s32.totalorder %s27_s15, %s27_s15 }
   0xe   :  { %p209_p5 = scmp.ne.s32.totalorder %s27_s15, %s208_s19  ;;  %p214_p7 = scmp.lt.s32.totalorder %s208_s19, %s208_s19 }
  0x10   :  { %p215_p8 = por %p214_p7, %p213_p6 }
  0x12   :  { %p216_p9 = pnand %p215_p8, %p209_p5 }
  0x14   :  { %219 = shalt.err (!%p216_p9)
}
  0x15   :  { %s248_s20 = smov 128   ;;  %s249_s21 = smov 8  }
  0x16   :  { %32 = dma.hbm_to_vmem [thread:$0]  %s318_s1, 3200, %s27_s15, [#allocation6], %s248_s20, %s248_s20, %s249_s21  }
  0x17   :  { %240 = dma.done.wait [#allocation3], 32  }
  0x18   :  { %241 = vsyncadd [#allocation3], 4294967264 }
  0x19   :  { %242 = dma.done.wait [#allocation6], 3200  }
  0x1a   :  { %243 = vsyncadd [#allocation6], 4294964096  ;;  %v250_v0 = vmov 0.0   ;;  %v69_v1 = vlaneseq  ;;  %v57_v2 = vld [vmem:[#allocation5 + $0x78] sm:$0xff]  ;;  %v56_v3 = vld [vmem:[#allocation5 + $0x70] sm:$0xff]  ;;  %vm78_vm0 = vcmask 556032  }
  0x1b   :  { %85 = vmatprep.subr.mxu0 %v250_v0  ;;  %v55_v5 = vld [vmem:[#allocation5 + $0x68] sm:$0xff]  ;;  %v54_v6 = vld [vmem:[#allocation5 + $0x60] sm:$0xff]  ;;  %v53_v8 = vld [vmem:[#allocation5 + $0x58] sm:$0xff]  ;;  %vm81_vm1 = vcmask 1043456   ;;  %s251_s24 = smov [#allocation7]  }
  0x1c   :  { %86 = vmatpush1.msra.mxu0 %v57_v2  ;;  %v279_v4 = vshrl.u32 %v69_v1, 7  ;;  %v52_v9 = vld [vmem:[#allocation5 + $0x50] sm:$0xff]  ;;  %v286_v10 = vld [vmem:[#allocation2] sm:$0x3]  ;;  %v51_v12 = vld [vmem:[#allocation5 + $0x48] sm:$0xff]  ;;  %s162_s25 = sshll.u32 %s251_s24, 4  ;;  %s163_s25 = int_to_ptr.vmem [resolvable:$true] %s162_s25 }
  0x1d   :  { %87 = vmatprep.subr.mxu0 %v250_v0  ;;  %v50_v13 = vld [vmem:[#allocation5 + $0x40] sm:$0xff]  ;;  %v49_v14 = vld [vmem:[#allocation5 + $0x38] sm:$0xff]  ;;  %v48_v15 = vld [vmem:[#allocation5 + $0x30] sm:$0xff]  ;;  %s220_s26 = scalar_lea.vmem %s163_s25, 16  ;;  %s224_s27 = scalar_lea.vmem %s163_s25, 32 }
  0x1e   :  { %88 = vmatpush1.msra.mxu0 %v56_v3  ;;  %v75_v7 = vsub.s32 1, %v279_v4  ;;  %v47_v16 = vld [vmem:[#allocation5 + $0x28] sm:$0xff]  ;;  %v46_v17 = vld [vmem:[#allocation5 + $0x20] sm:$0xff]  ;;  %v45_v18 = vld [vmem:[#allocation5 + $0x18] sm:$0xff]  ;;  %v71_v29 = vsub.s32 0, %v279_v4  ;;  %p221_p10 = scmp.ne.s32.totalorder %s163_s25, %s220_s26  ;;  %p225_p11 = scmp.lt.s32.totalorder %s163_s25, %s163_s25 }
  0x1f   :  { %89 = vmatprep.subr.mxu0 %v250_v0  ;;  %v44_v19 = vld [vmem:[#allocation5 + $0x10] sm:$0xff]  ;;  %v43_v20 = vld [vmem:[#allocation5 + $0x8] sm:$0xff]  ;;  %v42_v21 = vld [vmem:[#allocation5] sm:$0xff]  ;;  %p226_p12 = scmp.lt.s32.totalorder %s224_s27, %s220_s26 }
  0x20   :  { %90 = vmatpush1.msra.mxu0 %v55_v5  ;;  %v76_v11 = vrot.slane %v286_v10, %v75_v7  ;;  %v66_v22 = vld [vmem:[#allocation5 + $0xc0] sm:$0xf]  ;;  %v65_v23 = vld [vmem:[#allocation5 + $0xb8] sm:$0xff]  ;;  %v64_v24 = vld [vmem:[#allocation5 + $0xb0] sm:$0xff]  ;;  %v72_v32 = vrot.slane %v286_v10, %v71_v29 }
  0x21   :  { %91 = vmatprep.subr.mxu0 %v250_v0  ;;  %v63_v25 = vld [vmem:[#allocation5 + $0xa8] sm:$0xff]  ;;  %v62_v26 = vld [vmem:[#allocation5 + $0xa0] sm:$0xff]  ;;  %v61_v27 = vld [vmem:[#allocation5 + $0x98] sm:$0xff]  ;;  %p227_p13 = por %p226_p12, %p225_p11 }
  0x22   :  { %92 = vmatpush1.msra.mxu0 %v54_v6  ;;  %173 = vmatprep.mubr.msk.f32.mxu0 %vm78_vm0, %v76_v11  ;;  %v60_v28 = vld [vmem:[#allocation5 + $0x90] sm:$0xff]  ;;  %v59_v30 = vld [vmem:[#allocation5 + $0x88] sm:$0xff]  ;;  %v58_v31 = vld [vmem:[#allocation5 + $0x80] sm:$0xff] }
  0x23   :  { %93 = vmatprep.subr.mxu0 %v250_v0  ;;  %v67_v33 = vld [vmem:[%s319_s2] sm:$0x1]  ;;  %p228_p0 = pnand %p227_p13, %p221_p10 }
  0x24   :  { %94 = vmatpush1.msra.mxu0 %v53_v8 }
  0x25   :  { %95 = vmatprep.subr.mxu0 %v250_v0 }
  0x26   :  { %96 = vmatpush1.msra.mxu0 %v52_v9 }
  0x27   :  { %97 = vmatprep.subr.mxu0 %v250_v0 }
  0x28   :  { %98 = vmatpush1.msra.mxu0 %v51_v12 }
  0x29   :  { %99 = vmatprep.subr.mxu0 %v250_v0 }
  0x2a   :  { %100 = vmatpush1.msra.mxu0 %v50_v13 }
  0x2b   :  { %101 = vmatprep.subr.mxu0 %v250_v0 }
  0x2c   :  { %102 = vmatpush1.msra.mxu0 %v49_v14 }
  0x2d   :  { %103 = vmatprep.subr.mxu0 %v250_v0 }
  0x2e   :  { %104 = vmatpush1.msra.mxu0 %v48_v15 }
  0x2f   :  { %105 = vmatprep.subr.mxu0 %v250_v0 }
  0x30   :  { %106 = vmatpush1.msra.mxu0 %v47_v16 }
  0x31   :  { %107 = vmatprep.subr.mxu0 %v250_v0 }
  0x32   :  { %108 = vmatpush1.msra.mxu0 %v46_v17 }
  0x33   :  { %109 = vmatprep.subr.mxu0 %v250_v0 }
  0x34   :  { %110 = vmatpush1.msra.mxu0 %v45_v18 }
  0x35   :  { %111 = vmatprep.subr.mxu0 %v250_v0 }
  0x36   :  { %112 = vmatpush1.msra.mxu0 %v44_v19 }
  0x37   :  { %113 = vmatprep.subr.mxu0 %v250_v0 }
  0x38   :  { %114 = vmatpush1.msra.mxu0 %v43_v20 }
  0x39   :  { %115 = vmatprep.subr.mxu0 %v250_v0 }
  0x3a   :  { %116 = vmatpush1.msra.mxu0 %v42_v21 }
  0x3b   :  { %131 = vmatprep.subr.mxu0 %v250_v0 }
  0x3c   :  { %172 = vmatpush2.msk.msra.mxu0 %vm81_vm1, %v66_v22 }
  0x3d   :  { %133 = vmatprep.subr.mxu0 %v250_v0 }
  0x3e   :  { %134 = vmatpush2.msra.mxu0 %v65_v23 }
  0x3f   :  { %135 = vmatprep.subr.mxu0 %v250_v0 }
  0x40   :  { %136 = vmatpush2.msra.mxu0 %v64_v24 }
  0x41   :  { %137 = vmatprep.subr.mxu0 %v250_v0 }
  0x42   :  { %138 = vmatpush2.msra.mxu0 %v63_v25 }
  0x43   :  { %139 = vmatprep.subr.mxu0 %v250_v0 }
  0x44   :  { %140 = vmatpush2.msra.mxu0 %v62_v26 }
  0x45   :  { %141 = vmatprep.subr.mxu0 %v250_v0 }
  0x46   :  { %142 = vmatpush2.msra.mxu0 %v61_v27 }
  0x47   :  { %143 = vmatprep.subr.mxu0 %v250_v0 }
  0x48   :  { %144 = vmatpush2.msra.mxu0 %v60_v28 }
  0x49   :  { %145 = vmatprep.subr.mxu0 %v250_v0 }
  0x4a   :  { %146 = vmatpush2.msra.mxu0 %v59_v30 }
  0x4b   :  { %147 = vmatprep.subr.mxu0 %v250_v0 }
  0x4c   :  { %148 = vmatpush2.msra.mxu0 %v58_v31 }
  0x4d   :  { %150 = vmatmul.mubr.f32.vlgmr.msra.gmra.mxu0 %v72_v32 }
 0x10d   :  { %v151_v34 = vpop.f32.mrf.mxu0 }
 0x10e   :  { %v152_v35 = vadd.f32 %v151_v34, %v67_v33 }
 0x10f   :  { %v153_v36 = vpop.f32.mrf.mxu0 }
 0x110   :  { %155 = vst [vmem:[#allocation7] sm:$0x1] %v152_v35 }
 0x111   :  { %231 = shalt.err (!%p228_p0)
}
 0x112   :  { %165 = dma.vmem_to_hbm [thread:$0]  %s163_s25, 16, %s320_s3, [#allocation4]  }
 0x113   :  { %244 = dma.done.wait [#allocation4], 16  }
 0x114   :  { %245 = vsyncadd [#allocation4], 4294967280 }
 0x115   :  { %169 = vsyncpa [#allocation3], 1 }
 0x116   :  { %170 = vsyncpa [#allocation6], 1 }
 0x117   :  { %171 = vsyncpa [#allocation4], 1 }

// kernel: tpu_custom_call.1
= control target key start
LH: loop header
LB: loop body
LE: loop exit
PB: predicated region body
PF: predicated region fallthrough
CT: control target
= control target key end

     0   :  { %8 = vsyncpa [#allocation3], 0  ;;  %s317_s0 = inlined_call_operand.hbm [shape: f32[1,196], index: 0, kind: input, shape index: {}]   ;;  %s318_s1 = inlined_call_operand.hbm [shape: f32[196,128], index: 1, kind: input, shape index: {}]   ;;  %s319_s2 = inlined_call_operand.vmem [shape: f32[1,128], index: 2, kind: input, shape index: {}]   ;;  %s320_s3 = inlined_call_operand.hbm [shape: f32[1,128], index: 3, kind: output, shape index: {}]  }
   0x1   :  { %9 = vsyncpa [#allocation6], 0 }
   0x2   :  { %10 = vsyncpa [#allocation4], 0  ;;  %s246_s12 = smov [#allocation2]   ;;  %s247_s14 = smov [#allocation5]  }
   0x3   :  { %s17_s13 = sshll.u32 %s246_s12, 4  ;;  %s26_s15 = sshll.u32 %s247_s14, 4  ;;  %s18_s13 = int_to_ptr.vmem [resolvable:$true] %s17_s13  ;;  %s27_s15 = int_to_ptr.vmem [resolvable:$true] %s26_s15 }
   0x4   :  { %s188_s16 = scalar_lea.vmem %s18_s13, 32  ;;  %p193_p1 = scmp.lt.s32.totalorder %s18_s13, %s18_s13 }
   0x5   :  { %p189_p0 = scmp.ne.s32.totalorder %s18_s13, %s188_s16  ;;  %p194_p2 = scmp.lt.s32.totalorder %s188_s16, %s188_s16 }
   0x7   :  { %p195_p3 = por %p194_p2, %p193_p1 }
   0x9   :  { %p196_p4 = pnand %p195_p3, %p189_p0 }
   0xb   :  { %199 = shalt.err (!%p196_p4)
}
   0xc   :  { %20 = dma.hbm_to_vmem [thread:$0]  %s317_s0, 32, %s18_s13, [#allocation3]  }
   0xd   :  { %s208_s19 = scalar_lea.vmem %s27_s15, 3200  ;;  %p213_p6 = scmp.lt.s32.totalorder %s27_s15, %s27_s15 }
   0xe   :  { %p209_p5 = scmp.ne.s32.totalorder %s27_s15, %s208_s19  ;;  %p214_p7 = scmp.lt.s32.totalorder %s208_s19, %s208_s19 }
  0x10   :  { %p215_p8 = por %p214_p7, %p213_p6 }
  0x12   :  { %p216_p9 = pnand %p215_p8, %p209_p5 }
  0x14   :  { %219 = shalt.err (!%p216_p9)
}
  0x15   :  { %s248_s20 = smov 128   ;;  %s249_s21 = smov 8  }
  0x16   :  { %32 = dma.hbm_to_vmem [thread:$0]  %s318_s1, 3200, %s27_s15, [#allocation6], %s248_s20, %s248_s20, %s249_s21  }
  0x17   :  { %240 = dma.done.wait [#allocation3], 32  }
  0x18   :  { %241 = vsyncadd [#allocation3], 4294967264 }
  0x19   :  { %242 = dma.done.wait [#allocation6], 3200  }
  0x1a   :  { %243 = vsyncadd [#allocation6], 4294964096  ;;  %v250_v0 = vmov 0.0   ;;  %v69_v1 = vlaneseq  ;;  %v57_v2 = vld [vmem:[#allocation5 + $0x78] sm:$0xff]  ;;  %v56_v3 = vld [vmem:[#allocation5 + $0x70] sm:$0xff]  ;;  %vm78_vm0 = vcmask 556032  }
  0x1b   :  { %85 = vmatprep.subr.mxu0 %v250_v0  ;;  %v55_v5 = vld [vmem:[#allocation5 + $0x68] sm:$0xff]  ;;  %v54_v6 = vld [vmem:[#allocation5 + $0x60] sm:$0xff]  ;;  %v53_v8 = vld [vmem:[#allocation5 + $0x58] sm:$0xff]  ;;  %vm81_vm1 = vcmask 1043456   ;;  %s251_s24 = smov [#allocation7]  }
  0x1c   :  { %86 = vmatpush1.msra.mxu0 %v57_v2  ;;  %v279_v4 = vshrl.u32 %v69_v1, 7  ;;  %v52_v9 = vld [vmem:[#allocation5 + $0x50] sm:$0xff]  ;;  %v286_v10 = vld [vmem:[#allocation2] sm:$0x3]  ;;  %v51_v12 = vld [vmem:[#allocation5 + $0x48] sm:$0xff]  ;;  %s162_s25 = sshll.u32 %s251_s24, 4  ;;  %s163_s25 = int_to_ptr.vmem [resolvable:$true] %s162_s25 }
  0x1d   :  { %87 = vmatprep.subr.mxu0 %v250_v0  ;;  %v50_v13 = vld [vmem:[#allocation5 + $0x40] sm:$0xff]  ;;  %v49_v14 = vld [vmem:[#allocation5 + $0x38] sm:$0xff]  ;;  %v48_v15 = vld [vmem:[#allocation5 + $0x30] sm:$0xff]  ;;  %s220_s26 = scalar_lea.vmem %s163_s25, 16  ;;  %s224_s27 = scalar_lea.vmem %s163_s25, 32 }
  0x1e   :  { %88 = vmatpush1.msra.mxu0 %v56_v3  ;;  %v75_v7 = vsub.s32 1, %v279_v4  ;;  %v47_v16 = vld [vmem:[#allocation5 + $0x28] sm:$0xff]  ;;  %v46_v17 = vld [vmem:[#allocation5 + $0x20] sm:$0xff]  ;;  %v45_v18 = vld [vmem:[#allocation5 + $0x18] sm:$0xff]  ;;  %v71_v29 = vsub.s32 0, %v279_v4  ;;  %p221_p10 = scmp.ne.s32.totalorder %s163_s25, %s220_s26  ;;  %p225_p11 = scmp.lt.s32.totalorder %s163_s25, %s163_s25 }
  0x1f   :  { %89 = vmatprep.subr.mxu0 %v250_v0  ;;  %v44_v19 = vld [vmem:[#allocation5 + $0x10] sm:$0xff]  ;;  %v43_v20 = vld [vmem:[#allocation5 + $0x8] sm:$0xff]  ;;  %v42_v21 = vld [vmem:[#allocation5] sm:$0xff]  ;;  %p226_p12 = scmp.lt.s32.totalorder %s224_s27, %s220_s26 }
  0x20   :  { %90 = vmatpush1.msra.mxu0 %v55_v5  ;;  %v76_v11 = vrot.slane %v286_v10, %v75_v7  ;;  %v66_v22 = vld [vmem:[#allocation5 + $0xc0] sm:$0xf]  ;;  %v65_v23 = vld [vmem:[#allocation5 + $0xb8] sm:$0xff]  ;;  %v64_v24 = vld [vmem:[#allocation5 + $0xb0] sm:$0xff]  ;;  %v72_v32 = vrot.slane %v286_v10, %v71_v29 }
  0x21   :  { %91 = vmatprep.subr.mxu0 %v250_v0  ;;  %v63_v25 = vld [vmem:[#allocation5 + $0xa8] sm:$0xff]  ;;  %v62_v26 = vld [vmem:[#allocation5 + $0xa0] sm:$0xff]  ;;  %v61_v27 = vld [vmem:[#allocation5 + $0x98] sm:$0xff]  ;;  %p227_p13 = por %p226_p12, %p225_p11 }
  0x22   :  { %92 = vmatpush1.msra.mxu0 %v54_v6  ;;  %173 = vmatprep.mubr.msk.f32.mxu0 %vm78_vm0, %v76_v11  ;;  %v60_v28 = vld [vmem:[#allocation5 + $0x90] sm:$0xff]  ;;  %v59_v30 = vld [vmem:[#allocation5 + $0x88] sm:$0xff]  ;;  %v58_v31 = vld [vmem:[#allocation5 + $0x80] sm:$0xff] }
  0x23   :  { %93 = vmatprep.subr.mxu0 %v250_v0  ;;  %v67_v33 = vld [vmem:[%s319_s2] sm:$0x1]  ;;  %p228_p0 = pnand %p227_p13, %p221_p10 }
  0x24   :  { %94 = vmatpush1.msra.mxu0 %v53_v8 }
  0x25   :  { %95 = vmatprep.subr.mxu0 %v250_v0 }
  0x26   :  { %96 = vmatpush1.msra.mxu0 %v52_v9 }
  0x27   :  { %97 = vmatprep.subr.mxu0 %v250_v0 }
  0x28   :  { %98 = vmatpush1.msra.mxu0 %v51_v12 }
  0x29   :  { %99 = vmatprep.subr.mxu0 %v250_v0 }
  0x2a   :  { %100 = vmatpush1.msra.mxu0 %v50_v13 }
  0x2b   :  { %101 = vmatprep.subr.mxu0 %v250_v0 }
  0x2c   :  { %102 = vmatpush1.msra.mxu0 %v49_v14 }
  0x2d   :  { %103 = vmatprep.subr.mxu0 %v250_v0 }
  0x2e   :  { %104 = vmatpush1.msra.mxu0 %v48_v15 }
  0x2f   :  { %105 = vmatprep.subr.mxu0 %v250_v0 }
  0x30   :  { %106 = vmatpush1.msra.mxu0 %v47_v16 }
  0x31   :  { %107 = vmatprep.subr.mxu0 %v250_v0 }
  0x32   :  { %108 = vmatpush1.msra.mxu0 %v46_v17 }
  0x33   :  { %109 = vmatprep.subr.mxu0 %v250_v0 }
  0x34   :  { %110 = vmatpush1.msra.mxu0 %v45_v18 }
  0x35   :  { %111 = vmatprep.subr.mxu0 %v250_v0 }
  0x36   :  { %112 = vmatpush1.msra.mxu0 %v44_v19 }
  0x37   :  { %113 = vmatprep.subr.mxu0 %v250_v0 }
  0x38   :  { %114 = vmatpush1.msra.mxu0 %v43_v20 }
  0x39   :  { %115 = vmatprep.subr.mxu0 %v250_v0 }
  0x3a   :  { %116 = vmatpush1.msra.mxu0 %v42_v21 }
  0x3b   :  { %131 = vmatprep.subr.mxu0 %v250_v0 }
  0x3c   :  { %172 = vmatpush2.msk.msra.mxu0 %vm81_vm1, %v66_v22 }
  0x3d   :  { %133 = vmatprep.subr.mxu0 %v250_v0 }
  0x3e   :  { %134 = vmatpush2.msra.mxu0 %v65_v23 }
  0x3f   :  { %135 = vmatprep.subr.mxu0 %v250_v0 }
  0x40   :  { %136 = vmatpush2.msra.mxu0 %v64_v24 }
  0x41   :  { %137 = vmatprep.subr.mxu0 %v250_v0 }
  0x42   :  { %138 = vmatpush2.msra.mxu0 %v63_v25 }
  0x43   :  { %139 = vmatprep.subr.mxu0 %v250_v0 }
  0x44   :  { %140 = vmatpush2.msra.mxu0 %v62_v26 }
  0x45   :  { %141 = vmatprep.subr.mxu0 %v250_v0 }
  0x46   :  { %142 = vmatpush2.msra.mxu0 %v61_v27 }
  0x47   :  { %143 = vmatprep.subr.mxu0 %v250_v0 }
  0x48   :  { %144 = vmatpush2.msra.mxu0 %v60_v28 }
  0x49   :  { %145 = vmatprep.subr.mxu0 %v250_v0 }
  0x4a   :  { %146 = vmatpush2.msra.mxu0 %v59_v30 }
  0x4b   :  { %147 = vmatprep.subr.mxu0 %v250_v0 }
  0x4c   :  { %148 = vmatpush2.msra.mxu0 %v58_v31 }
  0x4d   :  { %150 = vmatmul.mubr.f32.vlgmr.msra.gmra.mxu0 %v72_v32 }
 0x10d   :  { %v151_v34 = vpop.f32.mrf.mxu0 }
 0x10e   :  { %v152_v35 = vadd.f32 %v151_v34, %v67_v33 }
 0x10f   :  { %v153_v36 = vpop.f32.mrf.mxu0 }
 0x110   :  { %155 = vst [vmem:[#allocation7] sm:$0x1] %v152_v35 }
 0x111   :  { %231 = shalt.err (!%p228_p0)
}
 0x112   :  { %165 = dma.vmem_to_hbm [thread:$0]  %s163_s25, 16, %s320_s3, [#allocation4]  }
 0x113   :  { %244 = dma.done.wait [#allocation4], 16  }
 0x114   :  { %245 = vsyncadd [#allocation4], 4294967280 }
 0x115   :  { %169 = vsyncpa [#allocation3], 1 }
 0x116   :  { %170 = vsyncpa [#allocation6], 1 }
 0x117   :  { %171 = vsyncpa [#allocation4], 1 }

</bundles_post_ra>
